<compile_context>
chip_gen: v7x
topology: tpu7x:2x2x1
jax: 0.10.0
libtpu: 0.0.40
codegen_flags: <defaults>
</compile_context>

<pallas_src>
import functools

import jax
import jax.numpy as jnp
from jax.experimental import pallas as pl
from jax.experimental.pallas import tpu as pltpu


def _round_up(x, m):
    return ((x + m - 1) // m) * m


# ---------------------------------------------------------------------------
# Reference (pure jnp) -- also used as the small-input fast path.
# ---------------------------------------------------------------------------
def _sym_cos_smearing_ref(angle, num_basis):
    freq = jnp.arange(1, num_basis + 1, dtype=jnp.float32)
    return jnp.cos(angle.reshape(-1, 1) * freq.reshape(1, -1))


# ---------------------------------------------------------------------------
# Kernels
# ---------------------------------------------------------------------------
def _smearing_kernel(angle_ref, out_ref, *, num_basis):
    # Unpacked path: angle_ref (tile, 1), out_ref (tile, num_basis).
    a = angle_ref[...]                                              # (tile, 1)
    k = jax.lax.broadcasted_iota(jnp.int32, (1, num_basis), 1)      # (1, G)
    freq = (k + 1).astype(jnp.float32)                              # [1..G]
    out_ref[...] = jnp.cos(a * freq)                                # (tile, G)


def _smearing_kernel_packed(pair_ref, out_ref, *, num_basis):
    # Row-packed path (even E): pair_ref (tile, 2) holds [angle[2i], angle[2i+1]]
    # per row; out_ref (tile, 2*num_basis) holds the two corresponding output
    # rows concatenated along lanes (a free row-major reshape of (E, G)).
    width = 2 * num_basis
    lane = jax.lax.broadcasted_iota(jnp.int32, (1, width), 1)       # (1, 2G)
    first_half = lane < num_basis
    # freq pattern [1..G, 1..G] built via select (avoids an integer rem).
    freq = (jnp.where(first_half, lane, lane - num_basis) + 1).astype(jnp.float32)
    a_even = pair_ref[:, 0:1]                                       # (tile, 1)
    a_odd = pair_ref[:, 1:2]                                        # (tile, 1)
    a = jnp.where(first_half, a_even, a_odd)                        # (tile, 2G)
    out_ref[...] = jnp.cos(a * freq)


# ---------------------------------------------------------------------------
# pallas_call wrappers
# ---------------------------------------------------------------------------
def _pallas_packed(angle, num_basis, tile_rows, vmem_limit_bytes):
    e = angle.shape[0]          # even
    half = e // 2
    width = 2 * num_basis
    pairs = angle.reshape(half, 2)                 # free row-major reshape
    tile_p = max(8, min(tile_rows // 2, _round_up(half, 8)))
    grid = (pl.cdiv(half, tile_p),)                # ragged last block is fine

    out = pl.pallas_call(
        functools.partial(_smearing_kernel_packed, num_basis=num_basis),
        out_shape=jax.ShapeDtypeStruct((half, width), jnp.float32),
        grid_spec=pl.GridSpec(
            grid=grid,
            in_specs=[pl.BlockSpec((tile_p, 2), lambda i: (i, 0))],
            out_specs=pl.BlockSpec((tile_p, width), lambda i: (i, 0)),
        ),
        compiler_params=pltpu.CompilerParams(
            dimension_semantics=("parallel",),
            vmem_limit_bytes=vmem_limit_bytes,
        ),
        cost_estimate=pl.CostEstimate(
            flops=e * num_basis,
            transcendentals=e * num_basis,
            bytes_accessed=e * (num_basis + 1) * 4,
        ),
    )(pairs)
    # Free reshape of the contiguous (E//2, 2G) buffer back to (E, G).
    return out.reshape(e, num_basis)


def _pallas_unpacked(angle, num_basis, tile_rows, vmem_limit_bytes):
    e = angle.shape[0]
    tile_e = max(8, min(tile_rows, _round_up(e, 8)))
    grid = (pl.cdiv(e, tile_e),)                   # ragged last block is fine

    return pl.pallas_call(
        functools.partial(_smearing_kernel, num_basis=num_basis),
        out_shape=jax.ShapeDtypeStruct((e, num_basis), jnp.float32),
        grid_spec=pl.GridSpec(
            grid=grid,
            in_specs=[pl.BlockSpec((tile_e, 1), lambda i: (i, 0))],
            out_specs=pl.BlockSpec((tile_e, num_basis), lambda i: (i, 0)),
        ),
        compiler_params=pltpu.CompilerParams(
            dimension_semantics=("parallel",),
            vmem_limit_bytes=vmem_limit_bytes,
        ),
        cost_estimate=pl.CostEstimate(
            flops=e * num_basis,
            transcendentals=e * num_basis,
            bytes_accessed=e * (num_basis + 1) * 4,
        ),
    )(angle.reshape(e, 1))


def symmetric_cosine_smearing(
    angle,
    *,
    num_basis=50,
    tile_rows=8192,            # angle rows consumed per grid step
    min_pallas_rows=1024,
    force_pallas=False,
    vmem_limit_bytes=32 * 1024 * 1024,
):
    """Pallas implementation of SymmetricCosineSmearing.forward.

    angle: jnp array of arbitrary shape (flattened like torch .view(-1, 1)).
    Returns: (E, num_basis) float32 array where E = angle.size.
    """
    angle = jnp.asarray(angle, jnp.float32).reshape(-1)
    e = angle.shape[0]

    if e == 0:
        return jnp.zeros((0, num_basis), jnp.float32)

    # Size-gated dispatch: for tiny graphs launch/pipeline overhead dominates
    # the ~E*num_basis*4 bytes of real work.
    if not force_pallas and e < min_pallas_rows:
        return _sym_cos_smearing_ref(angle, num_basis)

    if e % 2 == 0:
        return _pallas_packed(angle, num_basis, tile_rows, vmem_limit_bytes)
    # Odd E: row-packing would force an output slice copy; use the plain path.
    return _pallas_unpacked(angle, num_basis, tile_rows, vmem_limit_bytes)


if __name__ == "__main__":
    key = jax.random.PRNGKey(0)
    k1, k2, k3 = jax.random.split(key, 3)

    # Small even E -> row-packed Pallas path (force past the jnp size gate).
    angle_small = jax.random.uniform(
        k1, (100,), dtype=jnp.float32, minval=0.0, maxval=3.14159
    )
    out_small = jax.block_until_ready(
        symmetric_cosine_smearing(angle_small, force_pallas=True)
    )
    ref_small = _sym_cos_smearing_ref(angle_small, 50)
    assert out_small.shape == (100, 50), out_small.shape
    assert jnp.allclose(out_small, ref_small, atol=1e-5, rtol=1e-5), \
        "mismatch vs reference (small / packed)"

    # Small odd E -> unpacked fallback path with a ragged last block.
    angle_odd = jax.random.uniform(
        k2, (101,), dtype=jnp.float32, minval=0.0, maxval=3.14159
    )
    out_odd = jax.block_until_ready(
        symmetric_cosine_smearing(angle_odd, force_pallas=True)
    )
    ref_odd = _sym_cos_smearing_ref(angle_odd, 50)
    assert out_odd.shape == (101, 50), out_odd.shape
    assert jnp.allclose(out_odd, ref_odd, atol=1e-5, rtol=1e-5), \
        "mismatch vs reference (odd / unpacked)"

    # Larger even E with a small tile so the grid has several steps and a
    # ragged last block (exercises the multi-step pipeline + OOB masking).
    angle_big = jax.random.uniform(
        k3, (4098,), dtype=jnp.float32, minval=0.0, maxval=3.14159
    )
    out_big = jax.block_until_ready(
        symmetric_cosine_smearing(angle_big, tile_rows=1024)
    )
    ref_big = _sym_cos_smearing_ref(angle_big, 50)
    assert out_big.shape == (4098, 50), out_big.shape
    assert jnp.allclose(out_big, ref_big, atol=1e-5, rtol=1e-5), \
        "mismatch vs reference (big / packed, ragged)"

    print("KERNEL_OK")
</pallas_src>

<mosaic_0001>
module attributes {stable_mosaic.version = 11 : i64} {
  func.func @_smearing_kernel_packed(%arg0: i32, %arg1: memref<56x2xf32, #tpu.memory_space<vmem>>, %arg2: memref<56x100xf32, #tpu.memory_space<vmem>>) attributes {dimension_semantics = [#tpu.dimension_semantics<parallel>], iteration_bounds = array<i64: 1>, scalar_prefetch = 0 : i64, scratch_operands = 0 : i64, tpu.core_type = #tpu.core_type<tc>, window_params = [{transform_indices = @transform_0, window_bounds = array<i64: 56, 2>}, {transform_indices = @transform_1, window_bounds = array<i64: 56, 100>}]} {
    %0 = tpu.iota {dimensions = array<i32: 1>} : vector<1x100xi32>
    %c50_i32 = arith.constant 50 : i32
    %1 = vector.broadcast %c50_i32 : i32 to vector<1x100xi32>
    %2 = arith.cmpi slt, %0, %1 : vector<1x100xi32>
    %c50_i32_0 = arith.constant 50 : i32
    %3 = vector.broadcast %c50_i32_0 : i32 to vector<1x100xi32>
    %4 = arith.subi %0, %3 : vector<1x100xi32>
    %5 = arith.select %2, %0, %4 : vector<1x100xi1>, vector<1x100xi32>
    %c1_i32 = arith.constant 1 : i32
    %6 = vector.broadcast %c1_i32 : i32 to vector<1x100xi32>
    %7 = arith.addi %5, %6 : vector<1x100xi32>
    %8 = arith.sitofp %7 : vector<1x100xi32> to vector<1x100xf32>
    %c0 = arith.constant 0 : index
    %c0_1 = arith.constant 0 : index
    %9 = vector.load %arg1[%c0, %c0_1] : memref<56x2xf32, #tpu.memory_space<vmem>>, vector<56x1xf32>
    %c0_2 = arith.constant 0 : index
    %c1 = arith.constant 1 : index
    %10 = vector.load %arg1[%c0_2, %c1] : memref<56x2xf32, #tpu.memory_space<vmem>>, vector<56x1xf32>
    %11 = vector.shape_cast %2 : vector<1x100xi1> to vector<1x100xi1>
    %12 = vector.broadcast %11 : vector<1x100xi1> to vector<56x100xi1>
    %13 = vector.shape_cast %9 : vector<56x1xf32> to vector<56x1xf32>
    %14 = vector.broadcast %13 : vector<56x1xf32> to vector<56x100xf32>
    %15 = vector.shape_cast %10 : vector<56x1xf32> to vector<56x1xf32>
    %16 = vector.broadcast %15 : vector<56x1xf32> to vector<56x100xf32>
    %17 = arith.select %12, %14, %16 : vector<56x100xi1>, vector<56x100xf32>
    %18 = vector.broadcast %8 : vector<1x100xf32> to vector<56x100xf32>
    %19 = arith.mulf %17, %18 : vector<56x100xf32>
    %20 = math.cos %19 : vector<56x100xf32>
    %c0_3 = arith.constant 0 : index
    %c0_4 = arith.constant 0 : index
    %21 = vector.load %arg2[%c0_3, %c0_4] : memref<56x100xf32, #tpu.memory_space<vmem>>, vector<56x100xf32>
    tpu.vector_store %arg2[%c0_3, %c0_4], %20 {strides = array<i32>} : memref<56x100xf32, #tpu.memory_space<vmem>>, vector<56x100xf32>,
    return
  }
  func.func @transform_0(%arg0: i32) -> (i32, i32) {
    %c0_i32 = arith.constant 0 : i32
    %c0_i32_0 = arith.constant 0 : i32
    return %arg0, %c0_i32 : i32, i32
  }
  func.func @transform_1(%arg0: i32) -> (i32, i32) {
    %c0_i32 = arith.constant 0 : i32
    %c0_i32_0 = arith.constant 0 : i32
    return %arg0, %c0_i32 : i32, i32
  }
}

</mosaic_0001>

<bundles_post_ra>
// kernel: tpu_custom_call.1
= control target key start
LH: loop header
LB: loop body
LE: loop exit
PB: predicated region body
PF: predicated region fallthrough
CT: control target
= control target key end

     0   :  { %v971_v2 = vmov 0   ;;  %s1634_s0 = inlined_call_operand.vmem [shape: f32[50,2], index: 0, kind: input, shape index: {}]   ;;  %s1635_s1 = inlined_call_operand.hbm [shape: f32[50,100], index: 1, kind: output, shape index: {}]  }
   0x1   :  { %v18_v0 = vld [vmem:[%s1634_s0 + $0x10] sm:$0xff]  ;;  %v16_v1 = vld [vmem:[%s1634_s0] sm:$0xff]  ;;  %916 = vset.pattern.permute.xlu1 %v971_v2  ;;  %915 = vset.pattern.permute.xlu0 %v971_v2 }
   0x2   :  { %37 = vperm.xlu1 %916, %v18_v0   ;;  %27 = vperm.xlu0 %915, %v16_v1  }
   0x3   :  { %6 = vsyncpa [#allocation3], 0  ;;  %v19_v3 = vld [vmem:[%s1634_s0 + $0x18] sm:$0xff]  ;;  %v17_v4 = vld [vmem:[%s1634_s0 + $0x8] sm:$0xff]  ;;  %v972_v8 = vmov 1   ;;  %v9_v9 = vlaneseq }
   0x4   :  { %v21_v5 = vld [vmem:[%s1634_s0 + $0x28] sm:$0xff]  ;;  %v20_v6 = vld [vmem:[%s1634_s0 + $0x20] sm:$0xff]  ;;  %v22_v7 = vld [vmem:[%s1634_s0 + $0x30] sm:$0xff]  ;;  %v973_v52 = vmov 683565275   ;;  %s979_s0 = smov [#allocation2]  }
   0x5   :  { %v1013_v10 = vand.u32 127, %v9_v9  ;;  %v974_v54 = vmov 2475754826   ;;  %v975_v57 = vmov 2131351028   ;;  %s836_s20 = sshll.u32 %s979_s0, 4  ;;  %s837_s20 = int_to_ptr.vmem [resolvable:$true] %s836_s20 }
   0x6   :  { %42 = vperm.xlu1 %916, %v19_v3   ;;  %32 = vperm.xlu0 %915, %v17_v4   ;;  %v976_v59 = vmov 2102212464   ;;  %v977_v61 = vmov 920167782   ;;  %s947_s21 = scalar_lea.vmem %s837_s20, 896  ;;  %p952_p1 = scmp.lt.s32.totalorder %s837_s20, %s837_s20 }
   0x7   :  { %v847_v13 = vadd.s32 4294967246, %v1013_v10  ;;  %vm11_vm0 = vcmp.lt.s32.totalorder %v1013_v10, 50  ;;  %p948_p0 = scmp.ne.s32.totalorder %s837_s20, %s947_s21  ;;  %p953_p2 = scmp.lt.s32.totalorder %s947_s21, %s947_s21 }
   0x9   :  { %v13_v16 = vsel %vm11_vm0, %v1013_v10, %v847_v13  ;;  %p954_p3 = por %p953_p2, %p952_p1 }
   0xa   :  { %52 = vperm.xlu1 %916, %v21_v5   ;;  %47 = vperm.xlu0 %915, %v20_v6   ;;  %v14_v17 = vadd.s32 1, %v13_v16 }
   0xb   :  { %p955_p4 = pnand %p954_p3, %p948_p0 }
   0xc   :  { %v1026_v20 = vcvt.s32.f32 %v14_v17 }
   0xe   :  { %917 = vset.pattern.permute.xlu1 %v972_v8  ;;  %57 = vperm.xlu0 %915, %v22_v7  }
   0xf   :  { %61 = vperm.xlu1 %917, %v16_v1  }
  0x12   :  { %918 = vset.pattern.permute.xlu0 %v972_v8 }
  0x13   :  { %69 = vperm.xlu1 %917, %v18_v0   ;;  %65 = vperm.xlu0 %918, %v17_v4   ;;  %v978_v4 = vmov 1326507024  }
  0x17   :  { %73 = vperm.xlu1 %917, %v19_v3   ;;  %77 = vperm.xlu0 %918, %v20_v6  }
  0x1b   :  { %81 = vperm.xlu1 %917, %v21_v5   ;;  %85 = vperm.xlu0 %918, %v22_v7  }
  0x81   :  { %v38_v11 = vpop.permute.xlu1 %37  ;;  %v28_v12 = vpop.permute.xlu0 %27 }
  0x85   :  { %v1017_v14 = vpop.permute.xlu1 %42  ;;  %v33_v15 = vpop.permute.xlu0 %32 }
  0x89   :  { %v1022_v18 = vpop.permute.xlu1 %52  ;;  %v1024_v19 = vpop.permute.xlu0 %47 }
  0x8d   :  { %v1028_v21 = vpop.permute.xlu0 %57 }
  0x8e   :  { %v62_v22 = vpop.permute.xlu1 %61 }
  0x8f   :  { %v88_v23 = vsel %vm11_vm0, %v28_v12, %v62_v22 }
  0x90   :  { %v1033_v24 = vmul.f32 %v88_v23, %v1026_v20 }
  0x92   :  { %v102_v25 = vand.u32 2147483647, %v1033_v24  ;;  %v105_v26 = vand.u32 2139095040, %v1033_v24  ;;  %v70_v27 = vpop.permute.xlu1 %69  ;;  %v66_v28 = vpop.permute.xlu0 %65  ;;  %vm104_vm14 = vcmp.lt.s32.totalorder %v1033_v24, 0 }
  0x93   :  { %v90_v29 = vsel %vm11_vm0, %v38_v11, %v70_v27  ;;  %v89_v30 = vsel %vm11_vm0, %v33_v15, %v66_v28 }
  0x94   :  { %v106_v31 = vshrl.u32 %v105_v26, 23  ;;  %v1042_v32 = vmul.f32 %v90_v29, %v1026_v20  ;;  %v109_v33 = vand.u32 8388607, %v102_v25  ;;  %v1047_v34 = vmul.f32 %v89_v30, %v1026_v20 }
  0x96   :  { %v848_v35 = vadd.s32 4294967169, %v106_v31  ;;  %v308_v36 = vand.u32 2147483647, %v1042_v32  ;;  %v311_v37 = vand.u32 2139095040, %v1042_v32  ;;  %v110_v39 = vor.u32 8388608, %v109_v33 }
  0x97   :  { %v208_v42 = vand.u32 2139095040, %v1047_v34 }
  0x98   :  { %v112_v38 = vadd.s32 1, %v848_v35  ;;  %v312_v40 = vshrl.u32 %v311_v37, 23  ;;  %v315_v41 = vand.u32 8388607, %v308_v36  ;;  %v1054_v48 = vshll.u32 %v110_v39, 8 }
  0x99   :  { %v209_v45 = vshrl.u32 %v208_v42, 23 }
  0x9a   :  { %vm113_vm1 = vcmp.gt.s32.totalorder %v112_v38, 0  ;;  %v856_v44 = vadd.s32 4294967169, %v312_v40  ;;  %v316_v49 = vor.u32 8388608, %v315_v41 }
  0x9b   :  { %v114_v43 = vsel %vm113_vm1, %v112_v38, 0  ;;  %v852_v56 = vadd.s32 4294967169, %v209_v45  ;;  %v205_v38 = vand.u32 2147483647, %v1047_v34  ;;  %vm1164_vm1 = vcmp.le.f32.partialorder %v102_v25, 0.7853982 }
  0x9c   :  { %v115_v46 = vshrl.u32 %v114_v43, 5  ;;  %v116_v47 = vand.u32 31, %v114_v43  ;;  %v318_v50 = vadd.s32 1, %v856_v44  ;;  %v1076_v37 = vshll.u32 %v316_v49, 8 }
  0x9d   :  { %v215_v45 = vadd.s32 1, %v852_v56 }
  0x9e   :  { %v117_v51 = vsub.s32 32, %v116_v47  ;;  %v119_v53 = vshll.u32 %v973_v52, %v116_v47  ;;  %v122_v55 = vshll.u32 %v974_v54, %v116_v47  ;;  %v125_v58 = vshll.u32 %v975_v57, %v116_v47 }
  0x9f   :  { %v128_v60 = vshll.u32 %v976_v59, %v116_v47  ;;  %v131_v62 = vshll.u32 %v977_v61, %v116_v47  ;;  %vm134_vm2 = vcmp.lt.s32.totalorder %v115_v46, 1  ;;  %vm135_vm3 = vcmp.lt.s32.totalorder %v115_v46, 2 }
  0xa0   :  { %v120_v63 = vshrl.u32 %v974_v54, %v117_v51  ;;  %v123_v0 = vshrl.u32 %v975_v57, %v117_v51  ;;  %v126_v1 = vshrl.u32 %v976_v59, %v117_v51  ;;  %v118_v2 = vshrl.u32 %v973_v52, %v117_v51 }
  0xa1   :  { %v129_v3 = vshrl.u32 %v977_v61, %v117_v51  ;;  %v132_v5 = vshrl.u32 %v978_v4, %v117_v51  ;;  %vm136_vm4 = vcmp.lt.s32.totalorder %v115_v46, 3  ;;  %vm319_vm5 = vcmp.gt.s32.totalorder %v318_v50, 0 }
  0xa2   :  { %v121_v6 = vor.u32 %v120_v63, %v119_v53  ;;  %v124_v7 = vor.u32 %v123_v0, %v122_v55  ;;  %v127_v8 = vor.u32 %v126_v1, %v125_v58  ;;  %vm137_vm6 = vcmp.lt.s32.totalorder %v115_v46, 4 }
  0xa3   :  { %v130_v9 = vor.u32 %v129_v3, %v128_v60  ;;  %v133_v11 = vor.u32 %v132_v5, %v131_v62  ;;  %v320_v12 = vsel %vm319_vm5, %v318_v50, 0  ;;  %vm216_vm11 = vcmp.gt.s32.totalorder %v215_v45, 0 }
  0xa4   :  { %v138_v13 = vsel %vm134_vm2, %v118_v2, %v121_v6  ;;  %v139_v15 = vsel %vm137_vm6, %v127_v8, 2102212464  ;;  %v142_v16 = vsel %vm134_vm2, %v121_v6, %v124_v7  ;;  %v146_v17 = vsel %vm134_vm2, %v124_v7, %v127_v8 }
  0xa5   :  { %v140_v22 = vsel %vm136_vm4, %v124_v7, %v139_v15  ;;  %v143_v23 = vsel %vm137_vm6, %v130_v9, 920167782  ;;  %v147_v26 = vsel %vm137_vm6, %v133_v11, 1326507024  ;;  %v321_v27 = vshrl.u32 %v320_v12, 5 }
  0xa6   :  { %v141_v28 = vsel %vm135_vm3, %v138_v13, %v140_v22  ;;  %v144_v29 = vsel %vm136_vm4, %v127_v8, %v143_v23  ;;  %v148_v30 = vsel %vm136_vm4, %v130_v9, %v147_v26  ;;  %v322_v31 = vand.u32 31, %v320_v12 }
  0xa7   :  { %v145_v33 = vsel %vm135_vm3, %v142_v16, %v144_v29  ;;  %v149_v35 = vsel %vm135_vm3, %v146_v17, %v148_v30  ;;  %v157_v43 = vmul.u32 %v1054_v48, %v141_v28  ;;  %vm340_vm7 = vcmp.lt.s32.totalorder %v321_v27, 1 }
  0xa8   :  { %v1080_v39 = vmul.u32.u64.low %v1054_v48, %v149_v35  ;;  %v1081_v40 = vmul.u32.u64.high %v1054_v48, %v149_v35, %v1080_v39  ;;  %v1084_v41 = vmul.u32.u64.low %v1054_v48, %v145_v33  ;;  %v1085_v42 = vmul.u32.u64.high %v1054_v48, %v145_v33, %v1084_v41 }
  0xa9   :  { %v323_v44 = vsub.s32 32, %v322_v31  ;;  %v325_v46 = vshll.u32 %v973_v52, %v322_v31  ;;  %v328_v47 = vshll.u32 %v974_v54, %v322_v31  ;;  %v331_v49 = vshll.u32 %v975_v57, %v322_v31 }
  0xaa   :  { %v334_v50 = vshll.u32 %v976_v59, %v322_v31  ;;  %v337_v58 = vshll.u32 %v977_v61, %v322_v31  ;;  %vm159_vm8 = vc.u32 %v1081_v40, %v1084_v41  ;;  %v160_v48 = vadd.s32 1, %v1085_v42 }
  0xab   :  { %v326_v51 = vshrl.u32 %v974_v54, %v323_v44  ;;  %v329_v53 = vshrl.u32 %v975_v57, %v323_v44  ;;  %v332_v55 = vshrl.u32 %v976_v59, %v323_v44  ;;  %v335_v56 = vshrl.u32 %v977_v61, %v323_v44 }
  0xac   :  { %vm341_vm9 = vcmp.lt.s32.totalorder %v321_v27, 2  ;;  %v338_v0 = vshrl.u32 %v978_v4, %v323_v44  ;;  %v161_v1 = vsel %vm159_vm8, %v160_v48, %v1085_v42  ;;  %v324_v2 = vshrl.u32 %v973_v52, %v323_v44 }
  0xad   :  { %v327_v60 = vor.u32 %v326_v51, %v325_v46  ;;  %v330_v62 = vor.u32 %v329_v53, %v328_v47  ;;  %v333_v63 = vor.u32 %v332_v55, %v331_v49  ;;  %v336_v3 = vor.u32 %v335_v56, %v334_v50  ;;  %v74_v46 = vpop.permute.xlu1 %73 }
  0xae   :  { %vm343_vm10 = vcmp.lt.s32.totalorder %v321_v27, 4  ;;  %v162_v5 = vadd.s32 %v161_v1, %v157_v43  ;;  %v339_v6 = vor.u32 %v338_v0, %v337_v58  ;;  %vm342_vm12 = vcmp.lt.s32.totalorder %v321_v27, 3 }
  0xaf   :  { %v345_v7 = vsel %vm343_vm10, %v333_v63, 2102212464  ;;  %v348_v8 = vsel %vm340_vm7, %v327_v60, %v330_v62  ;;  %v349_v9 = vsel %vm343_vm10, %v336_v3, 920167782  ;;  %v352_v11 = vsel %vm340_vm7, %v330_v62, %v333_v63 }
  0xb0   :  { %v163_v12 = vadd.s32 536870912, %v162_v5  ;;  %v344_v13 = vsel %vm340_vm7, %v324_v2, %v327_v60  ;;  %v350_v15 = vsel %vm342_vm12, %v333_v63, %v349_v9  ;;  %v353_v16 = vsel %vm343_vm10, %v339_v6, 1326507024 }
  0xb1   :  { %v346_v17 = vsel %vm342_vm12, %v330_v62, %v345_v7  ;;  %v351_v22 = vsel %vm341_vm9, %v348_v8, %v350_v15  ;;  %v354_v23 = vsel %vm342_vm12, %v336_v3, %v353_v16  ;;  %v217_v26 = vsel %vm216_vm11, %v215_v45, 0 }
  0xb2   :  { %v1108_v28 = vshrl.u32 %v163_v12, 30  ;;  %v355_v29 = vsel %vm341_vm9, %v352_v11, %v354_v23  ;;  %v1112_v30 = vmul.u32.u64.low %v1076_v37, %v351_v22  ;;  %v1113_v31 = vmul.u32.u64.high %v1076_v37, %v351_v22, %v1112_v30 }
  0xb3   :  { %v1117_v33 = vmul.u32.u64.low %v1076_v37, %v355_v29  ;;  %v1118_v35 = vmul.u32.u64.high %v1076_v37, %v355_v29, %v1117_v33  ;;  %v219_v39 = vand.u32 31, %v217_v26  ;;  %v347_v43 = vsel %vm341_vm9, %v344_v13, %v346_v17 }
  0xb4   :  { %v165_v42 = vshll.u32 %v1108_v28, 30  ;;  %v1124_v44 = vand.u32 8388607, %v205_v38  ;;  %v366_v49 = vadd.s32 1, %v1113_v31  ;;  %v363_v50 = vmul.u32 %v1076_v37, %v347_v43 }
  0xb5   :  { %v220_v45 = vsub.s32 32, %v219_v39  ;;  %vm365_vm13 = vc.u32 %v1118_v35, %v1112_v30  ;;  %v91_v53 = vsel %vm11_vm0, %v1017_v14, %v74_v46  ;;  %v231_v48 = vshll.u32 %v976_v59, %v219_v39 }
  0xb6   :  { %v1126_v47 = vsub.s32 %v162_v5, %v165_v42  ;;  %v367_v27 = vsel %vm365_vm13, %v366_v49, %v1113_v31  ;;  %v213_v58 = vor.u32 8388608, %v1124_v44  ;;  %v1144_v1 = vshrl.u32 %v217_v26, 5 }
  0xb7   :  { %v368_v55 = vadd.s32 %v367_v27, %v363_v50  ;;  %v232_v56 = vshrl.u32 %v977_v61, %v220_v45  ;;  %v223_v60 = vshrl.u32 %v974_v54, %v220_v45  ;;  %v226_v62 = vshrl.u32 %v975_v57, %v220_v45 }
  0xb8   :  { %v168_v51 = vsub.s32 0, %v1126_v47  ;;  %v229_v63 = vshrl.u32 %v976_v59, %v220_v45  ;;  %v222_v14 = vshll.u32 %v973_v52, %v219_v39  ;;  %v225_v2 = vshll.u32 %v974_v54, %v219_v39 }
  0xb9   :  { %v369_v0 = vadd.s32 536870912, %v368_v55  ;;  %v228_v5 = vshll.u32 %v975_v57, %v219_v39  ;;  %v233_v6 = vor.u32 %v232_v56, %v231_v48  ;;  %v235_v7 = vshrl.u32 %v978_v4, %v220_v45 }
  0xba   :  { %v849_v37 = vmin.u32 %v168_v51, %v1126_v47  ;;  %v158_v8 = vadd.s32 %v1084_v41, %v1081_v40  ;;  %v234_v11 = vshll.u32 %v977_v61, %v219_v39  ;;  %v1157_v12 = vmul.f32 %v91_v53, %v1026_v20 }
  0xbb   :  { %v1153_v9 = vshrl.u32 %v369_v0, 30  ;;  %v224_v15 = vor.u32 %v223_v60, %v222_v14  ;;  %v227_v16 = vor.u32 %v226_v62, %v225_v2  ;;  %v230_v17 = vor.u32 %v229_v63, %v228_v5  ;;  %v78_v60 = vpop.permute.xlu0 %77 }
  0xbc   :  { %v170_v3 = vclz %v849_v37  ;;  %v188_v22 = vsub.s32 4, %v1108_v28  ;;  %v236_v26 = vor.u32 %v235_v7, %v234_v11  ;;  %vm240_vm15 = vcmp.lt.s32.totalorder %v1144_v1, 4 }
  0xbd   :  { %v371_v23 = vshll.u32 %v1153_v9, 30  ;;  %v221_v41 = vshrl.u32 %v973_v52, %v220_v45  ;;  %vm237_vm3 = vcmp.lt.s32.totalorder %v1144_v1, 1  ;;  %v246_v29 = vsel %vm240_vm15, %v233_v6, 920167782 }
  0xbe   :  { %v850_v13 = vadd.s32 4294967294, %v170_v3  ;;  %vm238_vm4 = vcmp.lt.s32.totalorder %v1144_v1, 2  ;;  %vm239_vm5 = vcmp.lt.s32.totalorder %v1144_v1, 3  ;;  %v242_v42 = vsel %vm240_vm15, %v230_v17, 2102212464 }
  0xbf   :  { %v1172_v33 = vsub.s32 %v368_v55, %v371_v23  ;;  %v245_v43 = vsel %vm237_vm3, %v224_v15, %v227_v16  ;;  %v247_v45 = vsel %vm239_vm5, %v230_v17, %v246_v29  ;;  %v249_v46 = vsel %vm237_vm3, %v227_v16, %v230_v17 }
  0xc0   :  { %vm851_vm2 = vcmp.lt.s32.totalorder %v850_v13, 0  ;;  %v250_v49 = vsel %vm240_vm15, %v236_v26, 1326507024  ;;  %v189_v55 = vsel %vm104_vm14, %v188_v22, %v1108_v28  ;;  %vm310_vm6 = vcmp.lt.s32.totalorder %v1042_v32, 0 }
  0xc1   :  { %v173_v31 = vsel %vm851_vm2, 0, %v850_v13  ;;  %v374_v44 = vsub.s32 0, %v1172_v33  ;;  %v251_v53 = vsel %vm239_vm5, %v233_v6, %v250_v49  ;;  %v248_v56 = vsel %vm238_vm4, %v245_v43, %v247_v45 }
  0xc2   :  { %v174_v39 = vsub.s32 32, %v173_v31  ;;  %v178_v25 = vsub.s32 4294967266, %v173_v31  ;;  %v175_v50 = vshll.u32 %v1126_v47, %v173_v31  ;;  %v253_v37 = vshll.u32 %v213_v58, 8 }
  0xc3   :  { %v857_v48 = vmin.u32 %v374_v44, %v1172_v33  ;;  %v241_v63 = vsel %vm237_vm3, %v221_v41, %v224_v15  ;;  %v252_v0 = vsel %vm238_vm4, %v249_v46, %v251_v53  ;;  %v243_v28 = vsel %vm239_vm5, %v227_v16, %v242_v42 }
  0xc4   :  { %v176_v51 = vshrl.u32 %v158_v8, %v174_v39  ;;  %v179_v27 = vadd.s32 127, %v178_v25  ;;  %v1203_v2 = vmul.u32.u64.low %v253_v37, %v252_v0  ;;  %v1204_v3 = vmul.u32.u64.high %v253_v37, %v252_v0, %v1203_v2 }
  0xc5   :  { %v376_v14 = vclz %v857_v48  ;;  %v1206_v6 = vmul.u32.u64.low %v253_v37, %v248_v56  ;;  %v1207_v7 = vmul.u32.u64.high %v253_v37, %v248_v56, %v1206_v6  ;;  %v92_v58 = vsel %vm11_vm0, %v1024_v19, %v78_v60 }
  0xc6   :  { %v177_v62 = vor.u32 %v176_v51, %v175_v50  ;;  %v180_v47 = vshll.u32 %v179_v27, 23  ;;  %v191_v8 = vsel %vm1164_vm1, 0, %v189_v55  ;;  %vm1216_vm7 = vcmp.le.f32.partialorder %v308_v36, 0.7853982 }
  0xc7   :  { %v858_v13 = vadd.s32 4294967294, %v376_v14  ;;  %v411_v15 = vand.u32 2147483647, %v1157_v12  ;;  %v414_v16 = vand.u32 2139095040, %v1157_v12  ;;  %v394_v23 = vsub.s32 4, %v1153_v9  ;;  %v82_v14 = vpop.permute.xlu1 %81 }
  0xc8   :  { %v181_v5 = vor.u32 4788187, %v180_v47  ;;  %v184_v22 = vcvt.s32.f32 %v177_v62  ;;  %v244_v19 = vsel %vm238_vm4, %v241_v63, %v243_v28  ;;  %v364_v26 = vadd.s32 %v1112_v30, %v1118_v35 }
  0xc9   :  { %vm859_vm8 = vcmp.lt.s32.totalorder %v858_v13, 0  ;;  %vm262_vm9 = vc.u32 %v1204_v3, %v1206_v6  ;;  %v415_v36 = vshrl.u32 %v414_v16, 23  ;;  %v263_v31 = vadd.s32 1, %v1207_v7 }
  0xca   :  { %v182_v17 = vand.u32 2147483647, %v181_v5  ;;  %v379_v29 = vsel %vm859_vm8, 0, %v858_v13  ;;  %v1230_v39 = vmul.f32 %v92_v58, %v1026_v20  ;;  %v260_v43 = vmul.u32 %v253_v37, %v244_v19 }
  0xcb   :  { %v380_v25 = vsub.s32 32, %v379_v29  ;;  %v384_v42 = vsub.s32 4294967266, %v379_v29  ;;  %v860_v44 = vadd.s32 4294967169, %v415_v36  ;;  %v381_v45 = vshll.u32 %v1172_v33, %v379_v29 }
  0xcc   :  { %v185_v41 = vmul.f32 %v184_v22, %v182_v17  ;;  %v395_v30 = vsel %vm310_vm6, %v394_v23, %v1153_v9  ;;  %v264_v35 = vsel %vm262_vm9, %v263_v31, %v1207_v7  ;;  %v418_v53 = vand.u32 8388607, %v411_v15 }
  0xcd   :  { %v382_v46 = vshrl.u32 %v364_v26, %v380_v25  ;;  %v385_v49 = vadd.s32 127, %v384_v42  ;;  %v265_v50 = vadd.s32 %v264_v35, %v260_v43  ;;  %v421_v51 = vadd.s32 1, %v860_v44 }
  0xce   :  { %v186_v1 = vxor.u32 2147483648, %v185_v41  ;;  %v514_v55 = vand.u32 2147483647, %v1230_v39  ;;  %v517_v33 = vand.u32 2139095040, %v1230_v39  ;;  %v1246_v60 = vand.u32 3, %v191_v8 }
  0xcf   :  { %v383_v48 = vor.u32 %v382_v46, %v381_v45  ;;  %v386_v56 = vshll.u32 %v385_v49, 23  ;;  %v266_v37 = vadd.s32 536870912, %v265_v50  ;;  %v397_v62 = vsel %vm1216_vm7, 0, %v395_v30 }
  0xd0   :  { %v187_v27 = vsel %vm104_vm14, %v186_v1, %v185_v41  ;;  %vm422_vm10 = vcmp.gt.s32.totalorder %v421_v51, 0  ;;  %v518_v0 = vshrl.u32 %v517_v33, 23  ;;  %v419_v28 = vor.u32 8388608, %v418_v53 }
  0xd1   :  { %v190_v9 = vsel %vm1164_vm1, %v1033_v24, %v187_v27  ;;  %v387_v47 = vor.u32 4788187, %v386_v56  ;;  %v1250_v63 = vshrl.u32 %v266_v37, 30  ;;  %v423_v2 = vsel %vm422_vm10, %v421_v51, 0 }
  0xd2   :  { %919 = vcosq.f32 %v190_v9  ;;  %v1254_v40 = vand.u32 8388607, %v514_v55  ;;  %v390_v7 = vcvt.s32.f32 %v383_v48  ;;  %vm200_vm11 = vcmp.eq.s32.totalorder %v1246_v60, 2 }
  0xd3   :  { %921 = vsinq.f32 %v190_v9  ;;  %v388_v5 = vand.u32 2147483647, %v387_v47  ;;  %v268_v58 = vshll.u32 %v1250_v63, 30  ;;  %v1258_v8 = vand.u32 3, %v397_v62 }
  0xd4   :  { %v425_v13 = vand.u32 31, %v423_v2  ;;  %v1263_v16 = vsel %vm11_vm0, %v1022_v18, %v82_v14  ;;  %vm197_vm12 = vcmp.eq.s32.totalorder %v1246_v60, 0  ;;  %v1267_v22 = vadd.s32 %v1206_v6, %v1204_v3 }
  0xd5   :  { %v391_v17 = vmul.f32 %v390_v7, %v388_v5  ;;  %v1269_v23 = vsub.s32 %v265_v50, %v268_v58  ;;  %v864_v19 = vadd.s32 4294967169, %v518_v0  ;;  %vm823_vm13 = vcmask 818176  }
  0xd6   :  { %vm196_vm14 = vcmp.lt.s32.totalorder %v1246_v60, 2  ;;  %v1272_v26 = vshrl.u32 %v423_v2, 5  ;;  %v426_v36 = vsub.s32 32, %v425_v13  ;;  %v1274_v41 = vshll.u32 %v419_v28, 8 }
  0xd7   :  { %v522_v18 = vor.u32 8388608, %v1254_v40  ;;  %vm194_vm15 = vweird.f32 %v1033_v24  ;;  %v392_v29 = vxor.u32 2147483648, %v391_v17  ;;  %v271_v31 = vsub.s32 0, %v1269_v23 }
  0xd8   :  { %v291_v3 = vsub.s32 4, %v1250_v63  ;;  %v428_v6 = vshll.u32 %v973_v52, %v425_v13  ;;  %v429_v25 = vshrl.u32 %v974_v54, %v426_v36  ;;  %v431_v42 = vshll.u32 %v974_v54, %v425_v13 }
  0xd9   :  { %v432_v43 = vshrl.u32 %v975_v57, %v426_v36  ;;  %v435_v44 = vshrl.u32 %v976_v59, %v426_v36  ;;  %v393_v1 = vsel %vm310_vm6, %v392_v29, %v391_v17  ;;  %v853_v45 = vmin.u32 %v271_v31, %v1269_v23 }
  0xda   :  { %v434_v30 = vshll.u32 %v975_v57, %v425_v13  ;;  %v524_v35 = vadd.s32 1, %v864_v19  ;;  %v396_v49 = vsel %vm1216_vm7, %v1042_v32, %v393_v1  ;;  %v430_v50 = vor.u32 %v429_v25, %v428_v6 }
  0xdb   :  { %v433_v51 = vor.u32 %v432_v43, %v431_v42  ;;  %vm443_vm1 = vcmp.lt.s32.totalorder %v1272_v26, 1  ;;  %923 = vcosq.f32 %v396_v49  ;;  %v273_v33 = vclz %v853_v45 }
  0xdc   :  { %v920_v46 = vpop.eup %919  ;;  %v436_v9 = vor.u32 %v435_v44, %v434_v30  ;;  %925 = vsinq.f32 %v396_v49  ;;  %v437_v56 = vshll.u32 %v976_v59, %v425_v13  ;;  %v438_v37 = vshrl.u32 %v977_v61, %v426_v36 }
  0xdd   :  { %v922_v27 = vpop.eup %921  ;;  %v201_v53 = vxor.u32 2147483648, %v920_v46  ;;  %v854_v11 = vadd.s32 4294967294, %v273_v33  ;;  %v440_v47 = vshll.u32 %v977_v61, %v425_v13  ;;  %v441_v0 = vshrl.u32 %v978_v4, %v426_v36 }
  0xde   :  { %v198_v48 = vxor.u32 2147483648, %v922_v27  ;;  %vm207_vm2 = vcmp.lt.s32.totalorder %v1047_v34, 0  ;;  %v427_v28 = vshrl.u32 %v973_v52, %v426_v36  ;;  %v439_v2 = vor.u32 %v438_v37, %v437_v56 }
  0xdf   :  { %v202_v62 = vsel %vm200_vm11, %v201_v53, %v922_v27  ;;  %vm444_vm3 = vcmp.lt.s32.totalorder %v1272_v26, 2  ;;  %vm406_vm4 = vcmp.eq.s32.totalorder %v1258_v8, 2  ;;  %vm855_vm5 = vcmp.lt.s32.totalorder %v854_v11, 0 }
  0xe0   :  { %v199_v14 = vsel %vm197_vm12, %v920_v46, %v198_v48  ;;  %v442_v7 = vor.u32 %v441_v0, %v440_v47  ;;  %vm446_vm6 = vcmp.lt.s32.totalorder %v1272_v26, 4  ;;  %vm403_vm7 = vcmp.eq.s32.totalorder %v1258_v8, 0 }
  0xe1   :  { %v203_v5 = vsel %vm196_vm14, %v199_v14, %v202_v62  ;;  %v276_v13 = vsel %vm855_vm5, 0, %v854_v11  ;;  %vm445_vm8 = vcmp.lt.s32.totalorder %v1272_v26, 3  ;;  %v448_v17 = vsel %vm446_vm6, %v436_v9, 2102212464 }
  0xe2   :  { %v204_v58 = vsel %vm194_vm15, nan, %v203_v5  ;;  %vm402_vm9 = vcmp.lt.s32.totalorder %v1258_v8, 2  ;;  %v277_v60 = vsub.s32 32, %v276_v13  ;;  %v281_v19 = vsub.s32 4294967266, %v276_v13 }
  0xe3   :  { %824 = vst.msk [vmem:[#allocation2] sm:$0xff] %vm823_vm13, %v204_v58  ;;  %v447_v36 = vsel %vm443_vm1, %v427_v28, %v430_v50  ;;  %v449_v24 = vsel %vm445_vm8, %v433_v51, %v448_v17  ;;  %vm400_vm10 = vweird.f32 %v1042_v32  ;;  %v278_v29 = vshll.u32 %v1269_v23, %v276_v13 }
  0xe4   :  { %v451_v31 = vsel %vm443_vm1, %v430_v50, %v433_v51  ;;  %v452_v6 = vsel %vm446_vm6, %v439_v2, 920167782  ;;  %v455_v25 = vsel %vm443_vm1, %v433_v51, %v436_v9  ;;  %v279_v42 = vshrl.u32 %v1267_v22, %v277_v60 }
  0xe5   :  { %v282_v43 = vadd.s32 127, %v281_v19  ;;  %v453_v44 = vsel %vm445_vm8, %v436_v9, %v452_v6  ;;  %v456_v1 = vsel %vm446_vm6, %v442_v7, 1326507024  ;;  %v450_v23 = vsel %vm444_vm3, %v447_v36, %v449_v24  ;;  %v924_v46 = vpop.eup %923 }
  0xe6   :  { %v454_v45 = vsel %vm444_vm3, %v451_v31, %v453_v44  ;;  %v457_v30 = vsel %vm445_vm8, %v439_v2, %v456_v1  ;;  %vm525_vm11 = vcmp.gt.s32.totalorder %v524_v35, 0  ;;  %v280_v49 = vor.u32 %v279_v42, %v278_v29  ;;  %v926_v27 = vpop.eup %925 }
  0xe7   :  { %v283_v22 = vshll.u32 %v282_v43, 23  ;;  %v458_v50 = vsel %vm444_vm3, %v455_v25, %v457_v30  ;;  %v526_v51 = vsel %vm525_vm11, %v524_v35, 0  ;;  %v407_v53 = vxor.u32 2147483648, %v924_v46 }
  0xe8   :  { %v1342_v33 = vmul.u32.u64.low %v1274_v41, %v458_v50  ;;  %v1343_v9 = vmul.u32.u64.high %v1274_v41, %v458_v50, %v1342_v33  ;;  %v1347_v48 = vshll.u32 %v522_v18, 8  ;;  %v404_v56 = vxor.u32 2147483648, %v926_v27 }
  0xe9   :  { %vm1351_vm12 = vcmp.le.f32.partialorder %v205_v38, 0.7853982  ;;  %v284_v26 = vor.u32 4788187, %v283_v22  ;;  %v1360_v35 = vsel %vm207_vm2, %v291_v3, %v1250_v63  ;;  %v528_v62 = vand.u32 31, %v526_v51 }
  0xea   :  { %v408_v40 = vsel %vm406_vm4, %v407_v53, %v926_v27  ;;  %v1365_v18 = vmul.u32.u64.low %v1274_v41, %v454_v45  ;;  %v1366_v11 = vmul.u32.u64.high %v1274_v41, %v454_v45, %v1365_v18  ;;  %v466_v38 = vmul.u32 %v1274_v41, %v450_v23 }
  0xeb   :  { %v405_v47 = vsel %vm403_vm7, %v924_v46, %v404_v56  ;;  %v285_v0 = vand.u32 2147483647, %v284_v26  ;;  %v287_v14 = vcvt.s32.f32 %v280_v49  ;;  %v529_v28 = vsub.s32 32, %v528_v62 }
  0xec   :  { %v409_v63 = vsel %vm402_vm9, %v405_v47, %v408_v40  ;;  %vm468_vm14 = vc.u32 %v1343_v9, %v1365_v18  ;;  %v527_v3 = vshrl.u32 %v526_v51, 5  ;;  %v531_v2 = vshll.u32 %v973_v52, %v528_v62  ;;  %v86_v47 = vpop.permute.xlu0 %85 }
  0xed   :  { %v410_v5 = vsel %vm400_vm10, nan, %v409_v63  ;;  %v288_v7 = vmul.f32 %v287_v14, %v285_v0  ;;  %v532_v41 = vshrl.u32 %v974_v54, %v529_v28  ;;  %v534_v58 = vshll.u32 %v974_v54, %v528_v62 }
  0xee   :  { %826 = vst.msk [vmem:[#allocation2 + $0x10] sm:$0xff] %vm823_vm13, %v410_v5  ;;  %v469_v13 = vadd.s32 1, %v1366_v11  ;;  %v535_v8 = vshrl.u32 %v975_v57, %v529_v28  ;;  %v537_v17 = vshll.u32 %v975_v57, %v528_v62  ;;  %v538_v60 = vshrl.u32 %v976_v59, %v529_v28 }
  0xef   :  { %v289_v19 = vxor.u32 2147483648, %v288_v7  ;;  %v533_v36 = vor.u32 %v532_v41, %v531_v2  ;;  %v540_v32 = vshll.u32 %v976_v59, %v528_v62  ;;  %v541_v24 = vshrl.u32 %v977_v61, %v529_v28 }
  0xf0   :  { %v470_v29 = vsel %vm468_vm14, %v469_v13, %v1366_v11  ;;  %v536_v31 = vor.u32 %v535_v8, %v534_v58  ;;  %v539_v6 = vor.u32 %v538_v60, %v537_v17  ;;  %v543_v25 = vshll.u32 %v977_v61, %v528_v62 }
  0xf1   :  { %v290_v42 = vsel %vm207_vm2, %v289_v19, %v288_v7  ;;  %v471_v43 = vadd.s32 %v470_v29, %v466_v38  ;;  %v542_v44 = vor.u32 %v541_v24, %v540_v32  ;;  %v544_v1 = vshrl.u32 %v978_v4, %v529_v28 }
  0xf2   :  { %v293_v23 = vsel %vm1351_vm12, %v1047_v34, %v290_v42  ;;  %v530_v45 = vshrl.u32 %v973_v52, %v529_v28  ;;  %vm546_vm15 = vcmp.lt.s32.totalorder %v527_v3, 1  ;;  %vm547_vm1 = vcmp.lt.s32.totalorder %v527_v3, 2 }
  0xf3   :  { %927 = vcosq.f32 %v293_v23  ;;  %v472_v30 = vadd.s32 536870912, %v471_v43  ;;  %v545_v46 = vor.u32 %v544_v1, %v543_v25  ;;  %vm549_vm3 = vcmp.lt.s32.totalorder %v527_v3, 4 }
  0xf4   :  { %929 = vsinq.f32 %v293_v23  ;;  %vm548_vm4 = vcmp.lt.s32.totalorder %v527_v3, 3  ;;  %v554_v49 = vsel %vm546_vm15, %v533_v36, %v536_v31  ;;  %v555_v22 = vsel %vm549_vm3, %v542_v44, 920167782 }
  0xf5   :  { %v473_v50 = vshrl.u32 %v472_v30, 30  ;;  %v551_v51 = vsel %vm549_vm3, %v539_v6, 2102212464  ;;  %v556_v27 = vsel %vm548_vm4, %v539_v6, %v555_v22  ;;  %v558_v53 = vsel %vm546_vm15, %v536_v31, %v539_v6 }
  0xf6   :  { %v294_v33 = vsel %vm1351_vm12, 0, %v1360_v35  ;;  %v557_v56 = vsel %vm547_vm1, %v554_v49, %v556_v27  ;;  %v559_v26 = vsel %vm549_vm3, %v545_v46, 1326507024  ;;  %v1408_v62 = vmul.f32 %v1263_v16, %v1026_v20 }
  0xf7   :  { %v474_v40 = vshll.u32 %v473_v50, 30  ;;  %v550_v11 = vsel %vm546_vm15, %v530_v45, %v533_v36  ;;  %v560_v38 = vsel %vm548_vm4, %v542_v44, %v559_v26  ;;  %v552_v0 = vsel %vm548_vm4, %v536_v31, %v551_v51 }
  0xf8   :  { %v561_v14 = vsel %vm547_vm1, %v558_v53, %v560_v38  ;;  %v1413_v28 = vmul.u32.u64.low %v1347_v48, %v557_v56  ;;  %v1414_v63 = vmul.u32.u64.high %v1347_v48, %v557_v56, %v1413_v28  ;;  %v298_v37 = vand.u32 3, %v294_v33 }
  0xf9   :  { %v1416_v35 = vsub.s32 %v471_v43, %v474_v40  ;;  %v1419_v2 = vmul.u32.u64.low %v1347_v48, %v561_v14  ;;  %v1420_v5 = vmul.u32.u64.high %v1347_v48, %v561_v14, %v1419_v2  ;;  %v620_v16 = vand.u32 2139095040, %v1408_v62 }
  0xfa   :  { %v94_v7 = vsel %vm11_vm0, %v1028_v21, %v86_v47  ;;  %vm297_vm2 = vweird.f32 %v1047_v34  ;;  %v553_v58 = vsel %vm547_vm1, %v550_v11, %v552_v0  ;;  %vm413_vm5 = vcmp.lt.s32.totalorder %v1157_v12, 0 }
  0xfb   :  { %v477_v41 = vsub.s32 0, %v1416_v35  ;;  %v572_v13 = vadd.s32 1, %v1414_v63  ;;  %v617_v8 = vand.u32 2147483647, %v1408_v62  ;;  %v621_v17 = vshrl.u32 %v620_v16, 23 }
  0xfc   :  { %vm300_vm6 = vcmp.eq.s32.totalorder %v298_v37, 0  ;;  %vm303_vm7 = vcmp.eq.s32.totalorder %v298_v37, 2  ;;  %v1434_v10 = vmul.f32 %v94_v7, %v1026_v20  ;;  %v569_v3 = vmul.u32 %v1347_v48, %v553_v58 }
  0xfd   :  { %v928_v60 = vpop.eup %927  ;;  %v861_v19 = vmin.u32 %v477_v41, %v1416_v35  ;;  %vm571_vm0 = vc.u32 %v1420_v5, %v1413_v28  ;;  %v868_v32 = vadd.s32 4294967169, %v621_v17  ;;  %v497_v31 = vsub.s32 4, %v473_v50 }
  0xfe   :  { %v930_v21 = vpop.eup %929  ;;  %v304_v36 = vxor.u32 2147483648, %v928_v60  ;;  %v573_v6 = vsel %vm571_vm0, %v572_v13, %v1414_v63  ;;  %v624_v43 = vand.u32 8388607, %v617_v8  ;;  %vm299_vm8 = vcmp.lt.s32.totalorder %v298_v37, 2 }
  0xff   :  { %v301_v24 = vxor.u32 2147483648, %v930_v21  ;;  %v479_v29 = vclz %v861_v19  ;;  %v574_v42 = vadd.s32 %v573_v6, %v569_v3  ;;  %v627_v44 = vadd.s32 1, %v868_v32 }
 0x100   :  { %v305_v25 = vsel %vm303_vm7, %v304_v36, %v930_v21  ;;  %v723_v48 = vand.u32 2139095040, %v1434_v10  ;;  %vm1445_vm9 = vcmp.le.f32.partialorder %v411_v15, 0.7853982  ;;  %v1453_v49 = vsel %vm413_vm5, %v497_v31, %v473_v50 }
 0x101   :  { %v302_v20 = vsel %vm300_vm6, %v928_v60, %v301_v24  ;;  %v862_v1 = vadd.s32 4294967294, %v479_v29  ;;  %v575_v30 = vadd.s32 536870912, %v574_v42  ;;  %vm628_vm10 = vcmp.gt.s32.totalorder %v627_v44, 0 }
 0x102   :  { %v306_v23 = vsel %vm299_vm8, %v302_v20, %v305_v25  ;;  %v629_v22 = vsel %vm628_vm10, %v627_v44, 0  ;;  %v625_v15 = vor.u32 8388608, %v624_v43  ;;  %v467_v33 = vadd.s32 %v1365_v18, %v1343_v9 }
 0x103   :  { %v307_v46 = vsel %vm297_vm2, nan, %v306_v23  ;;  %vm863_vm11 = vcmp.lt.s32.totalorder %v862_v1, 0  ;;  %v1456_v27 = vshrl.u32 %v575_v30, 30  ;;  %v631_v53 = vand.u32 31, %v629_v22 }
 0x104   :  { %825 = vst.msk [vmem:[#allocation2 + $0x8] sm:$0xff] %vm823_vm13, %v307_v46  ;;  %v482_v51 = vsel %vm863_vm11, 0, %v862_v1  ;;  %v724_v34 = vshrl.u32 %v723_v48, 23  ;;  %v500_v40 = vsel %vm1445_vm9, 0, %v1453_v49  ;;  %v570_v14 = vadd.s32 %v1413_v28, %v1420_v5 }
 0x105   :  { %v483_v56 = vsub.s32 32, %v482_v51  ;;  %v487_v26 = vsub.s32 4294967266, %v482_v51  ;;  %v577_v50 = vshll.u32 %v1456_v27, 30  ;;  %v632_v11 = vsub.s32 32, %v631_v53 }
 0x106   :  { %v484_v38 = vshll.u32 %v1416_v35, %v482_v51  ;;  %v1468_v37 = vshrl.u32 %v629_v22, 5  ;;  %v1471_v18 = vshll.u32 %v625_v15, 8  ;;  %v872_v41 = vadd.s32 4294967169, %v724_v34 }
 0x107   :  { %v485_v47 = vshrl.u32 %v467_v33, %v483_v56  ;;  %v488_v0 = vadd.s32 127, %v487_v26  ;;  %v1466_v63 = vsub.s32 %v574_v42, %v577_v50  ;;  %v635_v9 = vshrl.u32 %v974_v54, %v632_v11 }
 0x108   :  { %v638_v7 = vshrl.u32 %v975_v57, %v632_v11  ;;  %v634_v35 = vshll.u32 %v973_v52, %v631_v53  ;;  %v637_v13 = vshll.u32 %v974_v54, %v631_v53  ;;  %v641_v28 = vshrl.u32 %v976_v59, %v632_v11 }
 0x109   :  { %v486_v2 = vor.u32 %v485_v47, %v484_v38  ;;  %v489_v16 = vshll.u32 %v488_v0, 23  ;;  %v580_v58 = vsub.s32 0, %v1466_v63  ;;  %v600_v17 = vsub.s32 4, %v1456_v27 }
 0x10a   :  { %v633_v60 = vshrl.u32 %v973_v52, %v632_v11  ;;  %v640_v19 = vshll.u32 %v975_v57, %v631_v53  ;;  %v636_v3 = vor.u32 %v635_v9, %v634_v35  ;;  %v639_v32 = vor.u32 %v638_v7, %v637_v13 }
 0x10b   :  { %v490_v5 = vor.u32 4788187, %v489_v16  ;;  %v493_v21 = vcvt.s32.f32 %v486_v2  ;;  %v865_v36 = vmin.u32 %v580_v58, %v1466_v63  ;;  %v643_v31 = vshll.u32 %v976_v59, %v631_v53 }
 0x10c   :  { %v642_v29 = vor.u32 %v641_v28, %v640_v19  ;;  %v644_v6 = vshrl.u32 %v977_v61, %v632_v11  ;;  %v646_v42 = vshll.u32 %v977_v61, %v631_v53  ;;  %v647_v43 = vshrl.u32 %v978_v4, %v632_v11 }
 0x10d   :  { %v491_v24 = vand.u32 2147483647, %v490_v5  ;;  %v582_v25 = vclz %v865_v36  ;;  %vm649_vm12 = vcmp.lt.s32.totalorder %v1468_v37, 1  ;;  %vm650_vm14 = vcmp.lt.s32.totalorder %v1468_v37, 2 }
 0x10e   :  { %v645_v20 = vor.u32 %v644_v6, %v643_v31  ;;  %vm652_vm15 = vcmp.lt.s32.totalorder %v1468_v37, 4  ;;  %v648_v48 = vor.u32 %v647_v43, %v646_v42  ;;  %vm651_vm1 = vcmp.lt.s32.totalorder %v1468_v37, 3 }
 0x10f   :  { %v494_v44 = vmul.f32 %v493_v21, %v491_v24  ;;  %v866_v1 = vadd.s32 4294967294, %v582_v25  ;;  %v654_v23 = vsel %vm652_vm15, %v642_v29, 2102212464  ;;  %v653_v46 = vsel %vm649_vm12, %v633_v60, %v636_v3 }
 0x110   :  { %v657_v22 = vsel %vm649_vm12, %v636_v3, %v639_v32  ;;  %v658_v51 = vsel %vm652_vm15, %v645_v20, 920167782  ;;  %v655_v15 = vsel %vm651_vm1, %v639_v32, %v654_v23  ;;  %v661_v33 = vsel %vm649_vm12, %v639_v32, %v642_v29 }
 0x111   :  { %v495_v30 = vxor.u32 2147483648, %v494_v44  ;;  %vm867_vm3 = vcmp.lt.s32.totalorder %v866_v1, 0  ;;  %v659_v53 = vsel %vm651_vm1, %v642_v29, %v658_v51  ;;  %v662_v50 = vsel %vm652_vm15, %v648_v48, 1326507024 }
 0x112   :  { %v585_v26 = vsel %vm867_vm3, 0, %v866_v1  ;;  %v660_v34 = vsel %vm650_vm14, %v657_v22, %v659_v53  ;;  %v663_v9 = vsel %vm651_vm1, %v645_v20, %v662_v50  ;;  %v656_v19 = vsel %vm650_vm14, %v653_v46, %v655_v15 }
 0x113   :  { %v496_v56 = vsel %vm413_vm5, %v495_v30, %v494_v44  ;;  %v586_v38 = vsub.s32 32, %v585_v26  ;;  %v587_v47 = vshll.u32 %v1466_v63, %v585_v26  ;;  %v590_v0 = vsub.s32 4294967266, %v585_v26 }
 0x114   :  { %v499_v11 = vsel %vm1445_vm9, %v1157_v12, %v496_v56  ;;  %v1517_v2 = vmul.u32.u64.low %v1471_v18, %v660_v34  ;;  %v1518_v16 = vmul.u32.u64.high %v1471_v18, %v660_v34, %v1517_v2  ;;  %v664_v35 = vsel %vm650_vm14, %v661_v33, %v663_v9 }
 0x115   :  { %931 = vcosq.f32 %v499_v11  ;;  %v588_v7 = vshrl.u32 %v570_v14, %v586_v38  ;;  %v591_v58 = vadd.s32 127, %v590_v0  ;;  %v720_v63 = vand.u32 2147483647, %v1434_v10 }
 0x116   :  { %933 = vsinq.f32 %v499_v11  ;;  %v1524_v13 = vmul.u32.u64.low %v1471_v18, %v664_v35  ;;  %v1525_v28 = vmul.u32.u64.high %v1471_v18, %v664_v35, %v1524_v13  ;;  %v730_v21 = vadd.s32 1, %v872_v41 }
 0x117   :  { %v589_v5 = vor.u32 %v588_v7, %v587_v47  ;;  %v592_v60 = vshll.u32 %v591_v58, 23  ;;  %v504_v14 = vand.u32 3, %v500_v40  ;;  %vm516_vm4 = vcmp.lt.s32.totalorder %v1230_v39, 0 }
 0x118   :  { %v675_v36 = vadd.s32 1, %v1518_v16  ;;  %v601_v32 = vsel %vm516_vm4, %v600_v17, %v1456_v27  ;;  %vm731_vm2 = vcmp.gt.s32.totalorder %v730_v21, 0  ;;  %v672_v24 = vmul.u32 %v1471_v18, %v656_v19 }
 0x119   :  { %v593_v3 = vor.u32 4788187, %v592_v60  ;;  %vm674_vm5 = vc.u32 %v1525_v28, %v1517_v2  ;;  %v727_v45 = vand.u32 8388607, %v720_v63  ;;  %v732_v49 = vsel %vm731_vm2, %v730_v21, 0 }
 0x11a   :  { %v596_v37 = vcvt.s32.f32 %v589_v5  ;;  %v676_v41 = vsel %vm674_vm5, %v675_v36, %v1518_v16  ;;  %v734_v29 = vand.u32 31, %v732_v49  ;;  %vm503_vm6 = vweird.f32 %v1157_v12 }
 0x11b   :  { %v594_v40 = vand.u32 2147483647, %v593_v3  ;;  %vm505_vm7 = vcmp.lt.s32.totalorder %v504_v14, 2  ;;  %vm1548_vm0 = vcmp.le.f32.partialorder %v514_v55, 0.7853982  ;;  %v677_v18 = vadd.s32 %v676_v41, %v672_v24 }
 0x11c   :  { %vm506_vm8 = vcmp.eq.s32.totalorder %v504_v14, 0  ;;  %vm509_vm9 = vcmp.eq.s32.totalorder %v504_v14, 2  ;;  %v735_v31 = vsub.s32 32, %v734_v29  ;;  %v603_v25 = vsel %vm1548_vm0, 0, %v601_v32 }
 0x11d   :  { %v597_v17 = vmul.f32 %v596_v37, %v594_v40  ;;  %v678_v42 = vadd.s32 536870912, %v677_v18  ;;  %v728_v43 = vor.u32 8388608, %v727_v45  ;;  %v1554_v44 = vshrl.u32 %v732_v49, 5 }
 0x11e   :  { %v737_v55 = vshll.u32 %v973_v52, %v734_v29  ;;  %v738_v23 = vshrl.u32 %v974_v54, %v735_v31  ;;  %v740_v22 = vshll.u32 %v974_v54, %v734_v29  ;;  %v741_v51 = vshrl.u32 %v975_v57, %v735_v31 }
 0x11f   :  { %v932_v6 = vpop.eup %931  ;;  %v598_v48 = vxor.u32 2147483648, %v597_v17  ;;  %v1558_v46 = vshrl.u32 %v678_v42, 30  ;;  %v744_v33 = vshrl.u32 %v976_v59, %v735_v31  ;;  %v747_v56 = vshrl.u32 %v977_v61, %v735_v31 }
 0x120   :  { %v934_v20 = vpop.eup %933  ;;  %v510_v1 = vxor.u32 2147483648, %v932_v6  ;;  %v743_v54 = vshll.u32 %v975_v57, %v734_v29  ;;  %v739_v38 = vor.u32 %v738_v23, %v737_v55  ;;  %v746_v47 = vshll.u32 %v976_v59, %v734_v29 }
 0x121   :  { %v507_v30 = vxor.u32 2147483648, %v934_v20  ;;  %v599_v53 = vsel %vm516_vm4, %v598_v48, %v597_v17  ;;  %v680_v50 = vshll.u32 %v1558_v46, 30  ;;  %v742_v16 = vor.u32 %v741_v51, %v740_v22 }
 0x122   :  { %v511_v15 = vsel %vm509_vm9, %v510_v1, %v934_v20  ;;  %v602_v34 = vsel %vm1548_vm0, %v1230_v39, %v599_v53  ;;  %v745_v7 = vor.u32 %v744_v33, %v743_v54  ;;  %v748_v58 = vor.u32 %v747_v56, %v746_v47 }
 0x123   :  { %v508_v26 = vsel %vm506_vm8, %v932_v6, %v507_v30  ;;  %935 = vcosq.f32 %v602_v34  ;;  %v681_v9 = vsub.s32 %v677_v18, %v680_v50  ;;  %v749_v35 = vshll.u32 %v977_v61, %v734_v29 }
 0x124   :  { %v512_v11 = vsel %vm505_vm7, %v508_v26, %v511_v15  ;;  %937 = vsinq.f32 %v602_v34  ;;  %v750_v57 = vshrl.u32 %v978_v4, %v735_v31  ;;  %v607_v13 = vand.u32 3, %v603_v25 }
 0x125   :  { %v513_v0 = vsel %vm503_vm6, nan, %v512_v11  ;;  %v683_v5 = vsub.s32 0, %v681_v9  ;;  %v736_v60 = vshrl.u32 %v973_v52, %v735_v31  ;;  %vm752_vm10 = vcmp.lt.s32.totalorder %v1554_v44, 1 }
 0x126   :  { %827 = vst.msk [vmem:[#allocation2 + $0x18] sm:$0xff] %vm823_vm13, %v513_v0  ;;  %v751_v19 = vor.u32 %v750_v57, %v749_v35  ;;  %v768_v59 = vshll.u32 %v728_v43, 8  ;;  %vm754_vm11 = vcmp.lt.s32.totalorder %v1554_v44, 3  ;;  %vm755_vm12 = vcmp.lt.s32.totalorder %v1554_v44, 4 }
 0x127   :  { %v869_v12 = vmin.u32 %v683_v5, %v681_v9  ;;  %v760_v21 = vsel %vm752_vm10, %v739_v38, %v742_v16  ;;  %v757_v14 = vsel %vm755_vm12, %v745_v7, 2102212464  ;;  %v761_v36 = vsel %vm755_vm12, %v748_v58, 920167782 }
 0x128   :  { %v764_v3 = vsel %vm752_vm10, %v742_v16, %v745_v7  ;;  %v765_v61 = vsel %vm755_vm12, %v751_v19, 1326507024  ;;  %vm753_vm14 = vcmp.lt.s32.totalorder %v1554_v44, 2  ;;  %v762_v4 = vsel %vm754_vm11, %v745_v7, %v761_v36 }
 0x129   :  { %v685_v32 = vclz %v869_v12  ;;  %v766_v24 = vsel %vm754_vm11, %v748_v58, %v765_v61  ;;  %v756_v52 = vsel %vm752_vm10, %v736_v60, %v739_v38  ;;  %v758_v45 = vsel %vm754_vm11, %v742_v16, %v757_v14 }
 0x12a   :  { %v763_v49 = vsel %vm753_vm14, %v760_v21, %v762_v4  ;;  %v767_v40 = vsel %vm753_vm14, %v764_v3, %v766_v24  ;;  %vm606_vm15 = vweird.f32 %v1230_v39  ;;  %vm608_vm1 = vcmp.lt.s32.totalorder %v607_v13, 2 }
 0x12b   :  { %v870_v37 = vadd.s32 4294967294, %v685_v32  ;;  %v1589_v41 = vmul.u32.u64.low %v768_v59, %v767_v40  ;;  %v1590_v29 = vmul.u32.u64.high %v768_v59, %v767_v40, %v1589_v41  ;;  %v759_v25 = vsel %vm753_vm14, %v756_v52, %v758_v45 }
 0x12c   :  { %v1593_v18 = vmul.u32.u64.low %v768_v59, %v763_v49  ;;  %v1594_v17 = vmul.u32.u64.high %v768_v59, %v763_v49, %v1593_v18  ;;  %vm609_vm4 = vcmp.eq.s32.totalorder %v607_v13, 0  ;;  %vm612_vm2 = vcmp.eq.s32.totalorder %v607_v13, 2 }
 0x12d   :  { %v936_v27 = vpop.eup %935  ;;  %vm871_vm3 = vcmp.lt.s32.totalorder %v870_v37, 0  ;;  %v673_v1 = vadd.s32 %v1517_v2, %v1525_v28  ;;  %v775_v30 = vmul.u32 %v768_v59, %v759_v25  ;;  %vm619_vm6 = vcmp.lt.s32.totalorder %v1408_v62, 0 }
 0x12e   :  { %v938_v31 = vpop.eup %937  ;;  %v613_v6 = vxor.u32 2147483648, %v936_v27  ;;  %v688_v43 = vsel %vm871_vm3, 0, %v870_v37  ;;  %vm777_vm5 = vc.u32 %v1590_v29, %v1593_v18  ;;  %v778_v22 = vadd.s32 1, %v1594_v17 }
 0x12f   :  { %v610_v42 = vxor.u32 2147483648, %v938_v31  ;;  %v689_v48 = vsub.s32 32, %v688_v43  ;;  %v693_v55 = vsub.s32 4294967266, %v688_v43  ;;  %v690_v44 = vshll.u32 %v681_v9, %v688_v43 }
 0x130   :  { %v614_v20 = vsel %vm612_vm2, %v613_v6, %v938_v31  ;;  %v779_v56 = vsel %vm777_vm5, %v778_v22, %v1594_v17  ;;  %vm618_vm7 = vcmp.le.f32.partialorder %v617_v8, 0.7853982  ;;  %v703_v7 = vsub.s32 4, %v1558_v46 }
 0x131   :  { %v611_v23 = vsel %vm609_vm4, %v936_v27, %v610_v42  ;;  %v691_v15 = vshrl.u32 %v673_v1, %v689_v48  ;;  %v694_v53 = vadd.s32 127, %v693_v55  ;;  %v780_v26 = vadd.s32 %v779_v56, %v775_v30 }
 0x132   :  { %v615_v51 = vsel %vm608_vm1, %v611_v23, %v614_v20  ;;  %v704_v13 = vsel %vm619_vm6, %v703_v7, %v1558_v46  ;;  %v776_v21 = vadd.s32 %v1593_v18, %v1590_v29  ;;  %vm709_vm11 = vweird.f32 %v1408_v62 }
 0x133   :  { %v616_v33 = vsel %vm606_vm15, nan, %v615_v51  ;;  %v692_v2 = vor.u32 %v691_v15, %v690_v44  ;;  %v695_v28 = vshll.u32 %v694_v53, 23  ;;  %v781_v50 = vadd.s32 536870912, %v780_v26 }
 0x134   :  { %828 = vst.msk [vmem:[#allocation2 + $0x20] sm:$0xff] %vm823_vm13, %v616_v33  ;;  %v706_v19 = vsel %vm618_vm7, 0, %v704_v13  ;;  %vm722_vm12 = vcmp.lt.s32.totalorder %v1434_v10, 0  ;;  %vm721_vm14 = vcmp.le.f32.partialorder %v720_v63, 0.7853982  ;;  %vm812_vm4 = vweird.f32 %v1434_v10 }
 0x135   :  { %v696_v34 = vor.u32 4788187, %v695_v28  ;;  %v699_v11 = vcvt.s32.f32 %v692_v2  ;;  %v782_v38 = vshrl.u32 %v781_v50, 30  ;;  %v710_v12 = vand.u32 3, %v706_v19 }
 0x137   :  { %v697_v54 = vand.u32 2147483647, %v696_v34  ;;  %v783_v0 = vshll.u32 %v782_v38, 30  ;;  %vm715_vm8 = vcmp.eq.s32.totalorder %v710_v12, 2  ;;  %vm712_vm9 = vcmp.eq.s32.totalorder %v710_v12, 0 }
 0x138   :  { %vm711_vm10 = vcmp.lt.s32.totalorder %v710_v12, 2  ;;  %v806_v25 = vsub.s32 4, %v782_v38 }
 0x139   :  { %v700_v47 = vmul.f32 %v699_v11, %v697_v54  ;;  %v784_v16 = vsub.s32 %v780_v26, %v783_v0 }
 0x13b   :  { %v701_v9 = vxor.u32 2147483648, %v700_v47  ;;  %v786_v58 = vsub.s32 0, %v784_v16 }
 0x13d   :  { %v702_v39 = vsel %vm619_vm6, %v701_v9, %v700_v47  ;;  %v873_v57 = vmin.u32 %v786_v58, %v784_v16 }
 0x13e   :  { %v705_v35 = vsel %vm618_vm7, %v1408_v62, %v702_v39  ;;  %v807_v62 = vsel %vm722_vm12, %v806_v25, %v782_v38 }
 0x13f   :  { %939 = vcosq.f32 %v705_v35  ;;  %v788_v5 = vclz %v873_v57  ;;  %v809_v43 = vsel %vm721_vm14, 0, %v807_v62 }
 0x140   :  { %941 = vsinq.f32 %v705_v35  ;;  %v813_v20 = vand.u32 3, %v809_v43 }
 0x141   :  { %v874_v60 = vadd.s32 4294967294, %v788_v5 }
 0x142   :  { %vm818_vm15 = vcmp.eq.s32.totalorder %v813_v20, 2  ;;  %vm815_vm1 = vcmp.eq.s32.totalorder %v813_v20, 0  ;;  %vm814_vm3 = vcmp.lt.s32.totalorder %v813_v20, 2 }
 0x143   :  { %vm875_vm0 = vcmp.lt.s32.totalorder %v874_v60, 0 }
 0x144   :  { %v791_v59 = vsel %vm875_vm0, 0, %v874_v60 }
 0x145   :  { %v792_v8 = vsub.s32 32, %v791_v59  ;;  %v796_v14 = vsub.s32 4294967266, %v791_v59  ;;  %v793_v3 = vshll.u32 %v784_v16, %v791_v59 }
 0x147   :  { %v794_v61 = vshrl.u32 %v776_v21, %v792_v8  ;;  %v797_v32 = vadd.s32 127, %v796_v14 }
 0x149   :  { %v940_v36 = vpop.eup %939  ;;  %v795_v45 = vor.u32 %v794_v61, %v793_v3  ;;  %v798_v46 = vshll.u32 %v797_v32, 23 }
 0x14a   :  { %v942_v4 = vpop.eup %941  ;;  %v716_v24 = vxor.u32 2147483648, %v940_v36 }
 0x14b   :  { %v713_v52 = vxor.u32 2147483648, %v942_v4  ;;  %v799_v37 = vor.u32 4788187, %v798_v46  ;;  %v802_v18 = vcvt.s32.f32 %v795_v45 }
 0x14c   :  { %v717_v49 = vsel %vm715_vm8, %v716_v24, %v942_v4 }
 0x14d   :  { %v714_v40 = vsel %vm712_vm9, %v940_v36, %v713_v52  ;;  %v800_v27 = vand.u32 2147483647, %v799_v37 }
 0x14e   :  { %v718_v41 = vsel %vm711_vm10, %v714_v40, %v717_v49 }
 0x14f   :  { %v719_v29 = vsel %vm709_vm11, nan, %v718_v41  ;;  %v803_v17 = vmul.f32 %v802_v18, %v800_v27 }
 0x150   :  { %829 = vst.msk [vmem:[#allocation2 + $0x28] sm:$0xff] %vm823_vm13, %v719_v29 }
 0x151   :  { %v804_v31 = vxor.u32 2147483648, %v803_v17 }
 0x153   :  { %v805_v6 = vsel %vm722_vm12, %v804_v31, %v803_v17 }
 0x154   :  { %v808_v42 = vsel %vm721_vm14, %v1434_v10, %v805_v6 }
 0x155   :  { %943 = vcosq.f32 %v808_v42 }
 0x156   :  { %945 = vsinq.f32 %v808_v42 }
 0x15f   :  { %v944_v1 = vpop.eup %943 }
 0x160   :  { %v946_v48 = vpop.eup %945  ;;  %v819_v55 = vxor.u32 2147483648, %v944_v1 }
 0x161   :  { %v816_v23 = vxor.u32 2147483648, %v946_v48 }
 0x162   :  { %v820_v30 = vsel %vm818_vm15, %v819_v55, %v946_v48 }
 0x163   :  { %v817_v63 = vsel %vm815_vm1, %v944_v1, %v816_v23 }
 0x164   :  { %v821_v22 = vsel %vm814_vm3, %v817_v63, %v820_v30 }
 0x165   :  { %v822_v51 = vsel %vm812_vm4, nan, %v821_v22 }
 0x166   :  { %830 = vst.msk [vmem:[#allocation2 + $0x30] sm:$0xff] %vm823_vm13, %v822_v51 }
 0x167   :  { %958 = shalt.err (!%p955_p4)
}
 0x168   :  { %s959_s24 = scalar_lea.hbm %s1635_s1, 896 }
 0x169   :  { %p960_p5 = scmp.ne.s32.totalorder %s1635_s1, %s959_s24  ;;  %p963_p6 = scmp.lt.u32.totalorder %s959_s24, %s1635_s1 }
 0x16b   :  { %p965_p7 = pnand %p963_p6, %p960_p5 }
 0x16d   :  { %968 = shalt.err (!%p965_p7)
}
 0x16e   :  { %s980_s29 = smov 128   ;;  %s981_s30 = smov 8  }
 0x16f   :  { %842 = dma.vmem_to_hbm [thread:$0]  %s837_s20, 896, %s1635_s1, [#allocation3], %s980_s29, %s980_s29, %s981_s30  }
 0x170   :  { %969 = dma.done.wait [#allocation3], 896  }
 0x171   :  { %970 = vsyncadd [#allocation3], 4294966400 }
 0x172   :  { %846 = vsyncpa [#allocation3], 1 }

</bundles_post_ra>
